<compile_context>
chip_gen: v5e
topology: v5e:2x2
jax: 0.10.0
libtpu: 0.0.40
codegen_flags: <defaults>
</compile_context>

<pallas_src>
import functools
import math

import jax
import jax.numpy as jnp
from jax import lax
from jax.experimental import pallas as pl
from jax.experimental.pallas import tpu as pltpu


def _round_up(x, m):
    return ((x + m - 1) // m) * m


def _attention_kernel(x_ref, pos_ref, wqkv_ref, wc_ref, logits_ref, attn_ref,
                      *, batch, n_patches, dim_k, dkp, dp):
    # x_ref:     (B, N, DP)     zero-padded patches
    # pos_ref:   (1, N, DP)     zero-padded position embedding (broadcast over B)
    # wqkv_ref:  (DP, 3*DKP)    [Wq | Wk | Wv], each zero-padded to DKP lanes
    # wc_ref:    (DKP, CP)      classifier weight, bias folded into row dim_k
    # logits_ref:(B, CP)        lane-dense padded logits
    # attn_ref:  (B, N, N)      softmax attention (module output)
    xb = (x_ref[...] + pos_ref[...]).reshape(batch * n_patches, dp)     # (B*N, DP)

    # Fused QKV projection: one MXU push for the whole batch.
    qkv = jnp.dot(xb, wqkv_ref[...],
                  preferred_element_type=jnp.float32)                   # (B*N, 3*DKP)

    scale = 1.0 / math.sqrt(dim_k)
    # Lane-aligned slices (DKP % 128 == 0); fold the softmax scale into q.
    q = (qkv[:, 0:dkp] * scale).reshape(batch, n_patches, dkp)          # (B, N, DKP)
    k = qkv[:, dkp:2 * dkp].reshape(batch, n_patches, dkp)              # (B, N, DKP)
    v = qkv[:, 2 * dkp:3 * dkp].reshape(batch, n_patches, dkp)          # (B, N, DKP)

    # Batched scores (contract on last dims, zero-padded lanes are exact).
    scores = jnp.einsum('bqd,bkd->bqk', q, k,
                        preferred_element_type=jnp.float32)             # (B, N, N)

    # Numerically stable softmax; multiply by exact reciprocal (no VPU divide).
    m = jnp.max(scores, axis=-1, keepdims=True)
    e = jnp.exp(scores - m)
    attn = e * pl.reciprocal(jnp.sum(e, axis=-1, keepdims=True), approx=False)
    attn_ref[...] = attn                                                # (B, N, N)

    # mean_q(attn @ V) == (mean_q attn) @ V  — pool first, then one tiny matvec
    # realised as broadcast-multiply + sublane reduce (no MXU pushes needed).
    attn_pooled = jnp.mean(attn, axis=1)                                # (B, N)
    pooled = jnp.sum(attn_pooled[:, :, None] * v, axis=1)               # (B, DKP)

    # Bias trick: pooled[:, dim_k] is exactly 0 (zero-padded V lane); set it to
    # 1 so the classifier matmul picks up the bias stored in wc row dim_k.
    ones_col = (lax.broadcasted_iota(jnp.int32, pooled.shape, 1) == dim_k
                ).astype(pooled.dtype)
    logits_ref[...] = jnp.dot(pooled + ones_col, wc_ref[...],
                              preferred_element_type=jnp.float32)       # (B, CP)


def prepare_params(wq_t, wk_t, wv_t, wc_t, bc, pos_embed, *, dim_k):
    """One-time (model-init) constant prep: pad/fuse weights, fold the bias."""
    d_in, _ = wq_t.shape
    n_cls = wc_t.shape[1]
    dp = _round_up(d_in, 64)            # unmasked sublane tiles for wqkv rows
    dkp = _round_up(dim_k + 1, 128)     # +1 keeps a spare row/lane for the bias
    cp = _round_up(n_cls, 128)          # lane-dense logits store

    def pad2(w, rows, cols):
        return jnp.pad(w, ((0, rows - w.shape[0]), (0, cols - w.shape[1])))

    # Fused, lane-padded QKV weight (DP, 3*DKP); zero padding is a no-op.
    wqkv_pad = jnp.concatenate(
        [pad2(wq_t, dp, dkp), pad2(wk_t, dp, dkp), pad2(wv_t, dp, dkp)], axis=1)

    # Classifier weight with bias folded into row `dim_k`.
    wc_pad = jnp.zeros((dkp, cp), jnp.float32)
    wc_pad = wc_pad.at[:dim_k, :n_cls].set(wc_t)
    wc_pad = wc_pad.at[dim_k, :n_cls].set(bc[0])

    pos_pad = jnp.pad(pos_embed,
                      ((0, 0), (0, 0), (0, dp - pos_embed.shape[-1])))  # (1, N, DP)

    return wqkv_pad, wc_pad, pos_pad


@functools.partial(jax.jit, static_argnames=("dim_k", "num_classes"))
def single_head_attention(x, pos_pad, wqkv_pad, wc_pad, *, dim_k, num_classes):
    """x: (B, N, 49); pos_pad/wqkv_pad/wc_pad from prepare_params."""
    B, N, D = x.shape
    DP = wqkv_pad.shape[0]
    DKP = wc_pad.shape[0]
    CP = wc_pad.shape[1]

    # Per-call layout plumbing: tiny zero-pad of x, fused under jit.
    x_pad = jnp.pad(x, ((0, 0), (0, 0), (0, DP - D)))

    kernel = functools.partial(_attention_kernel, batch=B, n_patches=N,
                               dim_k=dim_k, dkp=DKP, dp=DP)

    flops = (2 * B * N * DP * 3 * DKP          # fused QKV projection
             + 2 * B * N * N * DKP             # scores
             + 2 * B * N * DKP                 # pooled @ V
             + 2 * B * DKP * CP)               # classifier
    bytes_accessed = 4 * (B * N * DP + N * DP + DP * 3 * DKP + DKP * CP
                          + B * CP + B * N * N)

    vmem = pl.BlockSpec(memory_space=pltpu.MemorySpace.VMEM)
    logits_pad, attn = pl.pallas_call(
        kernel,
        out_shape=(
            jax.ShapeDtypeStruct((B, CP), jnp.float32),    # padded logits
            jax.ShapeDtypeStruct((B, N, N), jnp.float32),  # normalised attention
        ),
        in_specs=[vmem] * 4,
        out_specs=(vmem, vmem),
        cost_estimate=pl.CostEstimate(flops=flops,
                                      transcendentals=B * N * N,
                                      bytes_accessed=bytes_accessed),
    )(x_pad, pos_pad, wqkv_pad, wc_pad)

    return logits_pad[:, :num_classes], attn


def reference_forward(x, pos_embed, wq_t, wk_t, wv_t, wc_t, bc, *, dim_k):
    xb = x + pos_embed
    q = xb @ wq_t
    k = xb @ wk_t
    v = xb @ wv_t
    scores = jnp.einsum("bqd,bkd->bqk", q, k) / math.sqrt(dim_k)
    attn = jax.nn.softmax(scores, axis=-1)
    hidden = jnp.einsum("bqk,bkd->bqd", attn, v)
    pooled = hidden.mean(axis=1)
    logits = pooled @ wc_t + bc[0]
    return logits, attn


if __name__ == "__main__":
    # Shapes consistent with the module: the input patch dim is fixed at 49 and
    # position_patch_embed (1, num_patches, dim_k) is added to x, so dim_k must
    # equal 49 (the module default) for the forward to be well-formed.
    B, N, D = 2, 8, 49
    dim_k = 49
    C = 10
    assert dim_k == D, "module adds a (1, N, dim_k) embedding to (B, N, 49) patches"

    key = jax.random.PRNGKey(0)
    k_x, k_q, k_k, k_v, k_c, k_b, k_p = jax.random.split(key, 7)

    x = jax.random.normal(k_x, (B, N, D), dtype=jnp.float32)

    # torch Linear weight is (out, in); we store the transpose (in, out).
    wq_t = jax.random.normal(k_q, (D, dim_k), dtype=jnp.float32) * 0.1
    wk_t = jax.random.normal(k_k, (D, dim_k), dtype=jnp.float32) * 0.1
    wv_t = jax.random.normal(k_v, (D, dim_k), dtype=jnp.float32) * 0.1
    wc_t = jax.random.normal(k_c, (dim_k, C), dtype=jnp.float32) * 0.1
    bc = jax.random.normal(k_b, (1, C), dtype=jnp.float32) * 0.1
    # position_patch_embed is zeros in the module; use small random values so
    # the broadcast/add path is actually exercised.
    pos_embed = jax.random.normal(k_p, (1, N, D), dtype=jnp.float32) * 0.02

    # One-time constant prep (model init), hoisted out of the call path.
    wqkv_pad, wc_pad, pos_pad = prepare_params(
        wq_t, wk_t, wv_t, wc_t, bc, pos_embed, dim_k=dim_k)

    logits, attn = single_head_attention(
        x, pos_pad, wqkv_pad, wc_pad, dim_k=dim_k, num_classes=C)
    logits = jax.block_until_ready(logits)
    attn = jax.block_until_ready(attn)

    ref_logits, ref_attn = reference_forward(
        x, pos_embed, wq_t, wk_t, wv_t, wc_t, bc, dim_k=dim_k)

    assert logits.shape == (B, C)
    assert attn.shape == (B, N, N)
    assert jnp.allclose(logits, ref_logits, atol=1e-4, rtol=1e-4)
    assert jnp.allclose(attn, ref_attn, atol=1e-5, rtol=1e-5)

    print("KERNEL_OK")
</pallas_src>

<mosaic_0001>
module attributes {stable_mosaic.version = 11 : i64} {
  func.func @_attention_kernel(%arg0: memref<2x8x64xf32, #tpu.memory_space<vmem>>, %arg1: memref<1x8x64xf32, #tpu.memory_space<vmem>>, %arg2: memref<64x384xf32, #tpu.memory_space<vmem>>, %arg3: memref<128x128xf32, #tpu.memory_space<vmem>>, %arg4: memref<2x128xf32, #tpu.memory_space<vmem>>, %arg5: memref<2x8x8xf32, #tpu.memory_space<vmem>>) attributes {dimension_semantics = [], scalar_prefetch = 0 : i64, scratch_operands = 0 : i64, tpu.core_type = #tpu.core_type<tc>} {
    %c0 = arith.constant 0 : index
    %c0_0 = arith.constant 0 : index
    %c0_1 = arith.constant 0 : index
    %0 = vector.load %arg0[%c0, %c0_0, %c0_1] : memref<2x8x64xf32, #tpu.memory_space<vmem>>, vector<2x8x64xf32>
    %c0_2 = arith.constant 0 : index
    %c0_3 = arith.constant 0 : index
    %c0_4 = arith.constant 0 : index
    %1 = vector.load %arg1[%c0_2, %c0_3, %c0_4] : memref<1x8x64xf32, #tpu.memory_space<vmem>>, vector<1x8x64xf32>
    %2 = vector.broadcast %1 : vector<1x8x64xf32> to vector<2x8x64xf32>
    %3 = arith.addf %0, %2 : vector<2x8x64xf32>
    %4 = vector.shape_cast %3 : vector<2x8x64xf32> to vector<16x64xf32>
    %c0_5 = arith.constant 0 : index
    %c0_6 = arith.constant 0 : index
    %5 = vector.load %arg2[%c0_5, %c0_6] : memref<64x384xf32, #tpu.memory_space<vmem>>, vector<64x384xf32>
    %cst = arith.constant dense<0.000000e+00> : vector<16x384xf32>
    %6 = tpu.matmul %4, %5, %cst {dimension_numbers = #tpu.dot_dimension_numbers<[1], [0], [0], [1], [0, 0, 1, 1], [], []>} : vector<16x64xf32>, vector<64x384xf32>, vector<16x384xf32> -> vector<16x384xf32>
    %7 = vector.extract_strided_slice %6 {offsets = [0, 0], sizes = [16, 128], strides = [1, 1]} : vector<16x384xf32> to vector<16x128xf32>
    %cst_7 = arith.constant 0.142857149 : f32
    %8 = vector.broadcast %cst_7 : f32 to vector<16x128xf32>
    %9 = arith.mulf %7, %8 : vector<16x128xf32>
    %10 = vector.shape_cast %9 : vector<16x128xf32> to vector<2x8x128xf32>
    %11 = vector.extract_strided_slice %6 {offsets = [0, 128], sizes = [16, 128], strides = [1, 1]} : vector<16x384xf32> to vector<16x128xf32>
    %12 = vector.shape_cast %11 : vector<16x128xf32> to vector<2x8x128xf32>
    %13 = vector.extract_strided_slice %6 {offsets = [0, 256], sizes = [16, 128], strides = [1, 1]} : vector<16x384xf32> to vector<16x128xf32>
    %14 = vector.shape_cast %13 : vector<16x128xf32> to vector<2x8x128xf32>
    "tpu.trace_start"() <{level = 10 : i32, message = "bqd,bkd->bqk"}> : () -> ()
    %cst_8 = arith.constant dense<0.000000e+00> : vector<2x8x8xf32>
    %15 = tpu.matmul %10, %12, %cst_8 {dimension_numbers = #tpu.dot_dimension_numbers<[2], [2], [1], [1], [0, 0, 0, 1, 1, 1], [0], [0]>} : vector<2x8x128xf32>, vector<2x8x128xf32>, vector<2x8x8xf32> -> vector<2x8x8xf32>
    "tpu.trace_stop"() : () -> ()
    %cst_9 = arith.constant dense<0xFF800000> : vector<2x8xf32>
    %16 = vector.multi_reduction <maximumf>, %15, %cst_9 [2] : vector<2x8x8xf32> to vector<2x8xf32>
    %17 = vector.shape_cast %16 : vector<2x8xf32> to vector<2x8x1xf32>
    %18 = vector.broadcast %17 : vector<2x8x1xf32> to vector<2x8x8xf32>
    %19 = arith.subf %15, %18 : vector<2x8x8xf32>
    %20 = math.exp %19 : vector<2x8x8xf32>
    %cst_10 = arith.constant dense<0.000000e+00> : vector<2x8xf32>
    %21 = vector.multi_reduction <add>, %20, %cst_10 [2] : vector<2x8x8xf32> to vector<2x8xf32>
    %22 = vector.shape_cast %21 : vector<2x8xf32> to vector<2x8x1xf32>
    %23 = tpu.reciprocal %22 : vector<2x8x1xf32> -> vector<2x8x1xf32>
    %24 = vector.broadcast %23 : vector<2x8x1xf32> to vector<2x8x8xf32>
    %25 = arith.mulf %20, %24 : vector<2x8x8xf32>
    %c0_11 = arith.constant 0 : index
    %c0_12 = arith.constant 0 : index
    %c0_13 = arith.constant 0 : index
    %26 = vector.load %arg5[%c0_11, %c0_12, %c0_13] : memref<2x8x8xf32, #tpu.memory_space<vmem>>, vector<2x8x8xf32>
    tpu.vector_store %arg5[%c0_11, %c0_12, %c0_13], %25 {strides = array<i32>} : memref<2x8x8xf32, #tpu.memory_space<vmem>>, vector<2x8x8xf32>,
    %cst_14 = arith.constant dense<0.000000e+00> : vector<2x8xf32>
    %27 = vector.multi_reduction <add>, %25, %cst_14 [1] : vector<2x8x8xf32> to vector<2x8xf32>
    %cst_15 = arith.constant 8.000000e+00 : f32
    %28 = vector.broadcast %cst_15 : f32 to vector<2x8xf32>
    %29 = arith.divf %27, %28 : vector<2x8xf32>
    %30 = vector.shape_cast %29 : vector<2x8xf32> to vector<2x8x1xf32>
    %31 = vector.broadcast %30 : vector<2x8x1xf32> to vector<2x8x128xf32>
    %32 = arith.mulf %31, %14 : vector<2x8x128xf32>
    %cst_16 = arith.constant dense<0.000000e+00> : vector<2x128xf32>
    %33 = vector.multi_reduction <add>, %32, %cst_16 [1] : vector<2x8x128xf32> to vector<2x128xf32>
    %34 = tpu.iota {dimensions = array<i32: 1>} : vector<2x128xi32>
    %c49_i32 = arith.constant 49 : i32
    %35 = vector.broadcast %c49_i32 : i32 to vector<2x128xi32>
    %36 = arith.cmpi eq, %34, %35 : vector<2x128xi32>
    %37 = arith.extui %36 : vector<2x128xi1> to vector<2x128xi32>
    %38 = arith.sitofp %37 : vector<2x128xi32> to vector<2x128xf32>
    %39 = arith.addf %33, %38 : vector<2x128xf32>
    %c0_17 = arith.constant 0 : index
    %c0_18 = arith.constant 0 : index
    %40 = vector.load %arg3[%c0_17, %c0_18] : memref<128x128xf32, #tpu.memory_space<vmem>>, vector<128x128xf32>
    %cst_19 = arith.constant dense<0.000000e+00> : vector<2x128xf32>
    %41 = tpu.matmul %39, %40, %cst_19 {dimension_numbers = #tpu.dot_dimension_numbers<[1], [0], [0], [1], [0, 0, 1, 1], [], []>} : vector<2x128xf32>, vector<128x128xf32>, vector<2x128xf32> -> vector<2x128xf32>
    %c0_20 = arith.constant 0 : index
    %c0_21 = arith.constant 0 : index
    %42 = vector.load %arg4[%c0_20, %c0_21] : memref<2x128xf32, #tpu.memory_space<vmem>>, vector<2x128xf32>
    tpu.vector_store %arg4[%c0_20, %c0_21], %41 {strides = array<i32>} : memref<2x128xf32, #tpu.memory_space<vmem>>, vector<2x128xf32>,
    return
  }
}

</mosaic_0001>

<bundles_post_ra>
// kernel: single_head_attention.1
= control target key start
LH: loop header
LB: loop body
LE: loop exit
PB: predicated region body
PF: predicated region fallthrough
CT: control target
= control target key end

     0   :  { %11 = vsyncpa [#allocation3], 0  ;;  %s602_s0 = inlined_call_operand.vmem [shape: f32[2,8,64], index: 0, kind: input, shape index: {}]   ;;  %s603_s1 = inlined_call_operand.vmem [shape: f32[1,8,64], index: 1, kind: input, shape index: {}]   ;;  %s604_s2 = inlined_call_operand.hbm [shape: f32[64,384], index: 2, kind: input, shape index: {}]   ;;  %s605_s3 = inlined_call_operand.hbm [shape: f32[128,128], index: 3, kind: input, shape index: {}]   ;;  %s606_s4 = inlined_call_operand.hbm [shape: f32[2,128], index: 4, kind: output, shape index: {0}]   ;;  %s607_s5 = inlined_call_operand.hbm [shape: f32[2,8,8], index: 5, kind: output, shape index: {1}]  }
   0x1   :  { %12 = vsyncpa [#allocation6], 0 }
   0x2   :  { %13 = vsyncpa [#allocation4], 0 }
   0x3   :  { %14 = vsyncpa [#allocation9], 0  ;;  %s23_s20 = sshll.u32 %s604_s2, 4  ;;  %s519_s21 = smov [#allocation2]   ;;  %s24_s20 = int_to_ptr.hbm [resolvable:$true] %s23_s20 }
   0x4   :  { %s25_s22 = sshll.u32 %s519_s21, 4  ;;  %s36_s25 = sshll.u32 %s605_s3, 4  ;;  %s26_s22 = int_to_ptr.vmem [resolvable:$true] %s25_s22  ;;  %s37_s25 = int_to_ptr.hbm [resolvable:$true] %s36_s25 }
   0x5   :  { %s520_s26 = smov 384   ;;  %s521_s27 = smov 24  }
   0x6   :  { %31 = dma.hbm_to_vmem [thread:$0]  %s24_s20, 3072, %s26_s22, [#allocation3], %s520_s26, %s520_s26, %s521_s27  }
   0x7   :  { %s522_s28 = smov [#allocation5]   ;;  %s523_s30 = smov 128  }
   0x8   :  { %s38_s29 = sshll.u32 %s522_s28, 4  ;;  %s524_s6 = smov 8   ;;  %s39_s29 = int_to_ptr.vmem [resolvable:$true] %s38_s29 }
   0x9   :  { %44 = dma.hbm_to_vmem [thread:$0]  %s37_s25, 2048, %s39_s29, [#allocation6], %s523_s30, %s523_s30, %s524_s6  }
   0xa   :  { %511 = dma.done.wait [#allocation3], 3072  }
   0xb   :  { %512 = vsyncadd [#allocation3], 4294964224 }
   0xc   :  { %513 = dma.done.wait [#allocation6], 2048  }
   0xd   :  { %514 = vsyncadd [#allocation6], 4294965248  ;;  %v80_v0 = vld [vmem:[#allocation2 + $0xb0] sm:$0xff]  ;;  %v79_v1 = vld [vmem:[#allocation2 + $0xa8] sm:$0xff]  ;;  %vm82_vm0 = vcmask 523264   ;;  %vm200_vm1 = vcmask 64512   ;;  %v274_v49 = vlaneseq }
   0xe   :  { %v77_v2 = vld [vmem:[#allocation2 + $0x98] sm:$0xff]  ;;  %120 = vmatpush.msra.mxu1 %v80_v0  ;;  %97 = vmatpush.msra.mxu0 %v79_v1  ;;  %v76_v3 = vld [vmem:[#allocation2 + $0x90] sm:$0xff]  ;;  %v74_v4 = vld [vmem:[#allocation2 + $0x80] sm:$0xff]  ;;  %v525_v52 = vmov 8.0   ;;  %vm326_vm12 = vcmask 1041409   ;;  %s367_s13 = sshll.u32 %s607_s5, 4  ;;  %s368_s13 = int_to_ptr.hbm [resolvable:$true] %s367_s13 }
   0xf   :  { %v73_v5 = vld [vmem:[#allocation2 + $0x78] sm:$0xff]  ;;  %v71_v6 = vld [vmem:[#allocation2 + $0x68] sm:$0xff]  ;;  %v70_v7 = vld [vmem:[#allocation2 + $0x60] sm:$0xff]  ;;  %v275_v50 = vshrl.u32 %v274_v49, 7  ;;  %s528_s14 = smov [#allocation7]   ;;  %s357_s18 = sshll.u32 %s606_s4, 4  ;;  %s358_s18 = int_to_ptr.hbm [resolvable:$true] %s357_s18 }
  0x10   :  { %121 = vmatpush.msra.mxu1 %v77_v2  ;;  %98 = vmatpush.msra.mxu0 %v76_v3  ;;  %v68_v8 = vld [vmem:[#allocation2 + $0x50] sm:$0xff]  ;;  %v67_v9 = vld [vmem:[#allocation2 + $0x48] sm:$0xff]  ;;  %v65_v10 = vld [vmem:[#allocation2 + $0x38] sm:$0xff]  ;;  %s355_s15 = sshll.u32 %s528_s14, 4  ;;  %s356_s15 = int_to_ptr.vmem [resolvable:$true] %s355_s15 }
  0x11   :  { %v64_v11 = vld [vmem:[#allocation2 + $0x30] sm:$0xff]  ;;  %v53_v12 = vld [vmem:[%s602_s0] sm:$0xff]  ;;  %v61_v15 = vld [vmem:[#allocation2 + $0x18] sm:$0xff]  ;;  %403 = vset.pattern.permute.xlu2 %v275_v50  ;;  %404 = vset.pattern.permute.xlu0 %v275_v50 }
  0x12   :  { %122 = vmatpush.msra.mxu1 %v74_v4  ;;  %99 = vmatpush.msra.mxu0 %v73_v5  ;;  %v55_v13 = vld [vmem:[%s603_s1] sm:$0xff]  ;;  %v59_v16 = vld [vmem:[#allocation2 + $0x8] sm:$0xff]  ;;  %v81_v31 = vld [vmem:[#allocation2 + $0xb8] sm:$0xff] }
  0x13   :  { %v62_v14 = vld [vmem:[#allocation2 + $0x20] sm:$0xff]  ;;  %v56_v18 = vadd.f32 %v55_v13, %v53_v12  ;;  %v54_v19 = vld [vmem:[%s602_s0 + $0x8] sm:$0xff]  ;;  %143 = vmatpush.msra.mxu2 %v81_v31  ;;  %v72_v34 = vld [vmem:[#allocation2 + $0x70] sm:$0xff]  ;;  %s527_s0 = smov [#allocation8]  }
  0x14   :  { %123 = vmatpush.msra.mxu1 %v71_v6  ;;  %100 = vmatpush.msra.mxu0 %v70_v7  ;;  %v58_v17 = vld [vmem:[#allocation2] sm:$0xff]  ;;  %v57_v20 = vadd.f32 %v55_v13, %v54_v19  ;;  %v75_v33 = vld [vmem:[#allocation2 + $0x88] sm:$0xff]  ;;  %v69_v35 = vld [vmem:[#allocation2 + $0x58] sm:$0xff]  ;;  %s365_s1 = sshll.u32 %s527_s0, 4  ;;  %s366_s1 = int_to_ptr.vmem [resolvable:$true] %s365_s1 }
  0x15   :  { %v78_v32 = vld [vmem:[#allocation2 + $0xa0] sm:$0xff]  ;;  %v63_v37 = vld [vmem:[#allocation2 + $0x28] sm:$0xff]  ;;  %v60_v40 = vld [vmem:[#allocation2 + $0x10] sm:$0xff] }
  0x16   :  { %124 = vmatpush.msra.mxu1 %v68_v8  ;;  %101 = vmatpush.msra.mxu0 %v67_v9  ;;  %v66_v36 = vld [vmem:[#allocation2 + $0x40] sm:$0xff]  ;;  %v322_v59 = vld [vmem:[#allocation5 + $0x78] sm:$0xff]  ;;  %v321_v60 = vld [vmem:[#allocation5 + $0x70] sm:$0xff] }
  0x17   :  { %144 = vmatpush.msra.mxu2 %v78_v32  ;;  %329 = vmatpush.msra.mxu3 %v322_v59  ;;  %v320_v63 = vld [vmem:[#allocation5 + $0x68] sm:$0xff]  ;;  %v301_v59 = vand.u32 127, %v274_v49 }
  0x18   :  { %125 = vmatpush.msra.mxu1 %v65_v10  ;;  %102 = vmatpush.msra.mxu0 %v64_v11  ;;  %v308_v50 = vld [vmem:[#allocation5 + $0x8] sm:$0xff] }
  0x19   :  { %145 = vmatpush.msra.mxu2 %v75_v33  ;;  %330 = vmatpush.msra.mxu3 %v321_v60  ;;  %vm302_vm11 = vcmp.eq.s32.totalorder %v301_v59, 49 }
  0x1a   :  { %126 = vmatpush.msra.mxu1 %v62_v14  ;;  %103 = vmatpush.msra.mxu0 %v61_v15 }
  0x1b   :  { %146 = vmatpush.msra.mxu2 %v72_v34  ;;  %331 = vmatpush.msra.mxu3 %v320_v63 }
  0x1c   :  { %127 = vmatpush.msra.mxu1 %v59_v16  ;;  %104 = vmatpush.msra.mxu0 %v58_v17 }
  0x1d   :  { %388 = vmatmul.msk.f32.vlgmr.msra.gmra.mxu1 %vm82_vm0, %v56_v18  ;;  %386 = vmatmul.msk.f32.vlgmr.msra.gmra.mxu0 %vm82_vm0, %v56_v18 }
  0x1e   :  { %147 = vmatpush.msra.mxu2 %v69_v35 }
  0x20   :  { %148 = vmatpush.msra.mxu2 %v66_v36 }
  0x22   :  { %149 = vmatpush.msra.mxu2 %v63_v37  ;;  %v319_v37 = vld [vmem:[#allocation5 + $0x60] sm:$0xff] }
  0x23   :  { %332 = vmatpush.msra.mxu3 %v319_v37 }
  0x24   :  { %150 = vmatpush.msra.mxu2 %v60_v40  ;;  %v316_v40 = vld [vmem:[#allocation5 + $0x48] sm:$0xff] }
  0x25   :  { %389 = vmatmul.msk.f32.gmra.mxu1 %vm82_vm0, %v57_v20  ;;  %387 = vmatmul.msk.f32.gmra.mxu0 %vm82_vm0, %v57_v20 }
  0x26   :  { %390 = vmatmul.msk.f32.vlgmr.msra.gmra.mxu2 %vm82_vm0, %v56_v18 }
  0x2e   :  { %391 = vmatmul.msk.f32.gmra.mxu2 %vm82_vm0, %v57_v20 }
  0x9a   :  { %v129_v21 = vpop.f32.mrf.mxu1  ;;  %v106_v22 = vpop.f32.mrf.mxu0 }
  0x9b   :  { %v158_v23 = vmul.f32 0.14285715, %v106_v22  ;;  %175 = vmatpush.xpose.msrb.mxu0 %v129_v21 }
  0x9e   :  { %176 = vmatmul.f32.vlgmr.msrb.gmra.mxu0 %v158_v23 }
  0xa2   :  { %v132_v24 = vpop.f32.mrf.mxu1  ;;  %v109_v25 = vpop.f32.mrf.mxu0 }
  0xa3   :  { %v159_v26 = vmul.f32 0.14285715, %v109_v25  ;;  %195 = vmatpush.xpose.msrb.mxu1 %v132_v24 }
  0xa6   :  { %196 = vmatmul.f32.vlgmr.msrb.gmra.mxu1 %v159_v26 }
 0x11b   :  { %v177_v29 = vpop.f32.mrf.mxu0 }
 0x11c   :  { %v201_v30 = vsel %vm200_vm1, %v177_v29, -inf }
 0x123   :  { %v197_v27 = vpop.f32.mrf.mxu1 }
 0x124   :  { %v204_v28 = vsel %vm200_vm1, %v197_v27, -inf }
 0x125   :  { %205 = vmax.xlane.f32.xlu0 %v204_v28 }
 0x12d   :  { %202 = vmax.xlane.f32.xlu0 %v201_v30 }
 0x198   :  { %v206_v38 = vpop.xlane.xlu0 %205 }
 0x199   :  { %v208_v39 = vsub.f32 %v197_v27, %v206_v38  ;;  %v318_v38 = vld [vmem:[#allocation5 + $0x58] sm:$0xff] }
 0x19a   :  { %333 = vmatpush.msra.mxu3 %v318_v38 }
 0x19b   :  { %v211_v41 = vmul.f32 1.442695, %v208_v39  ;;  %v317_v39 = vld [vmem:[#allocation5 + $0x50] sm:$0xff] }
 0x19c   :  { %334 = vmatpush.msra.mxu3 %v317_v39 }
 0x19d   :  { %405 = vpow2.f32 %v211_v41  ;;  %v315_v41 = vld [vmem:[#allocation5 + $0x40] sm:$0xff] }
 0x19e   :  { %335 = vmatpush.msra.mxu3 %v316_v40 }
 0x1a0   :  { %v203_v42 = vpop.xlane.xlu0 %202  ;;  %336 = vmatpush.msra.mxu3 %v315_v41 }
 0x1a1   :  { %v207_v43 = vsub.f32 %v177_v29, %v203_v42  ;;  %v314_v42 = vld [vmem:[#allocation5 + $0x38] sm:$0xff] }
 0x1a2   :  { %337 = vmatpush.msra.mxu3 %v314_v42 }
 0x1a3   :  { %v406_v44 = vpop.eup %405  ;;  %v209_v45 = vmul.f32 1.442695, %v207_v43  ;;  %v313_v43 = vld [vmem:[#allocation5 + $0x30] sm:$0xff] }
 0x1a4   :  { %v216_v46 = vsel %vm200_vm1, %v406_v44, 0.0  ;;  %338 = vmatpush.msra.mxu3 %v313_v43 }
 0x1a5   :  { %407 = vpow2.f32 %v209_v45  ;;  %217 = vadd.xlane.f32.xlu1 %v216_v46  ;;  %v311_v45 = vld [vmem:[#allocation5 + $0x20] sm:$0xff]  ;;  %v310_v46 = vld [vmem:[#allocation5 + $0x18] sm:$0xff] }
 0x1ab   :  { %v408_v47 = vpop.eup %407 }
 0x1ac   :  { %v213_v48 = vsel %vm200_vm1, %v408_v47, 0.0 }
 0x1ad   :  { %214 = vadd.xlane.f32.xlu1 %v213_v48  ;;  %v309_v48 = vld [vmem:[#allocation5 + $0x10] sm:$0xff] }
 0x218   :  { %v218_v51 = vpop.xlane.xlu1 %217 }
 0x219   :  { %409 = vrcp.f32 %v218_v51  ;;  %v244_v58 = vand.u32 2147483648, %v218_v51  ;;  %v242_v62 = vand.u32 2147483647, %v218_v51  ;;  %vm238_vm3 = vweird.f32 %v218_v51 }
 0x21a   :  { %411 = vrcp.f32 %v525_v52 }
 0x21b   :  { %v245_v3 = vor.u32 1.1754944e-38, %v244_v58  ;;  %vm243_vm5 = vcmp.eq.f32.partialorder %v242_v62, 8.507059e+37 }
 0x21f   :  { %v410_v53 = vpop.eup %409 }
 0x220   :  { %v234_v54 = vmul.f32 %v410_v53, %v218_v51  ;;  %v215_v55 = vpop.xlane.xlu1 %214  ;;  %v412_v57 = vpop.eup %411  ;;  %vm239_vm2 = vweird.f32 %v410_v53  ;;  %v307_v51 = vld [vmem:[#allocation5] sm:$0xff] }
 0x221   :  { %413 = vrcp.f32 %v215_v55  ;;  %v266_v1 = vmul.f32 8.0, %v412_v57  ;;  %vm240_vm4 = vmor %vm238_vm3, %vm239_vm2  ;;  %v230_v10 = vand.u32 2147483648, %v215_v55  ;;  %v228_v12 = vand.u32 2147483647, %v215_v55 }
 0x222   :  { %v235_v56 = vsub.f32 1.0, %v234_v54  ;;  %vm224_vm7 = vweird.f32 %v215_v55  ;;  %vm270_vm10 = vweird.f32 %v412_v57 }
 0x223   :  { %v267_v9 = vsub.f32 1.0, %v266_v1  ;;  %v231_v17 = vor.u32 1.1754944e-38, %v230_v10  ;;  %vm229_vm9 = vcmp.eq.f32.partialorder %v228_v12, 8.507059e+37 }
 0x224   :  { %v236_v61 = vmul.f32 %v410_v53, %v235_v56 }
 0x225   :  { %v268_v16 = vmul.f32 %v412_v57, %v267_v9 }
 0x226   :  { %v237_v0 = vadd.f32 %v410_v53, %v236_v61 }
 0x227   :  { %v414_v2 = vpop.eup %413  ;;  %v269_v23 = vadd.f32 %v412_v57, %v268_v16 }
 0x228   :  { %v241_v4 = vsel %vm240_vm4, %v410_v53, %v237_v0  ;;  %v220_v5 = vmul.f32 %v414_v2, %v215_v55  ;;  %vm225_vm6 = vweird.f32 %v414_v2 }
 0x229   :  { %v246_v6 = vsel %vm243_vm5, %v245_v3, %v241_v4  ;;  %vm226_vm8 = vmor %vm224_vm7, %vm225_vm6  ;;  %v271_v28 = vsel %vm270_vm10, %v412_v57, %v269_v23  ;;  %v526_v3 = vmov 0.0  }
 0x22a   :  { %v221_v7 = vsub.f32 1.0, %v220_v5  ;;  %v248_v8 = vmul.f32 %v406_v44, %v246_v6  ;;  %v312_v44 = vld [vmem:[#allocation5 + $0x28] sm:$0xff]  ;;  %v392_v4 = vsel %vm302_vm11, 1.0, %v526_v3 }
 0x22b   :  { %339 = vmatpush.msra.mxu3 %v312_v44 }
 0x22c   :  { %v222_v11 = vmul.f32 %v414_v2, %v221_v7  ;;  %v258_v13 = vsel %vm200_vm1, %v248_v8, 0.0  ;;  %250 = vst.msk [vmem:[#allocation8 + $0x8] sm:$0xff] %vm200_vm1, %v248_v8 }
 0x22d   :  { %v259_v14 = vrot.slane %v258_v13, 4  ;;  %340 = vmatpush.msra.mxu3 %v311_v45 }
 0x22e   :  { %v223_v15 = vadd.f32 %v414_v2, %v222_v11 }
 0x22f   :  { %v260_v18 = vadd.f32 %v259_v14, %v258_v13  ;;  %341 = vmatpush.msra.mxu3 %v310_v46 }
 0x230   :  { %v227_v19 = vsel %vm226_vm8, %v414_v2, %v223_v15 }
 0x231   :  { %v232_v20 = vsel %vm229_vm9, %v231_v17, %v227_v19  ;;  %v261_v21 = vrot.slane %v260_v18, 2  ;;  %342 = vmatpush.msra.mxu3 %v309_v48 }
 0x232   :  { %v247_v22 = vmul.f32 %v408_v47, %v232_v20  ;;  %v152_v47 = vpop.f32.mrf.mxu2 }
 0x233   :  { %v262_v24 = vadd.f32 %v261_v21, %v260_v18  ;;  %343 = vmatpush.msra.mxu3 %v308_v50 }
 0x234   :  { %249 = vst.msk [vmem:[#allocation8] sm:$0xff] %vm200_vm1, %v247_v22  ;;  %v251_v25 = vsel %vm200_vm1, %v247_v22, 0.0 }
 0x235   :  { %v263_v26 = vrot.slane %v262_v24, 1  ;;  %v252_v27 = vrot.slane %v251_v25, 4  ;;  %344 = vmatpush.msra.mxu3 %v307_v51  ;;  %373 = dma.vmem_to_hbm [thread:$0]  %s366_s1, 256, %s368_s13, [#allocation9], %s523_s30, %s523_s30, %s524_s6  }
 0x237   :  { %v264_v29 = vadd.f32 %v263_v26, %v262_v24  ;;  %v253_v30 = vadd.f32 %v252_v27, %v251_v25 }
 0x239   :  { %v273_v31 = vmul.f32 %v271_v28, %v264_v29  ;;  %v254_v32 = vrot.slane %v253_v30, 2 }
 0x23a   :  { %v155_v52 = vpop.f32.mrf.mxu2 }
 0x23b   :  { %284 = vperm.xlu2 %403, %v273_v31   ;;  %v255_v33 = vadd.f32 %v254_v32, %v253_v30 }
 0x23d   :  { %v256_v34 = vrot.slane %v255_v33, 1 }
 0x23f   :  { %v257_v35 = vadd.f32 %v256_v34, %v255_v33 }
 0x241   :  { %v272_v36 = vmul.f32 %v271_v28, %v257_v35 }
 0x243   :  { %278 = vperm.xlu2 %403, %v272_v36  }
 0x295   :  { %v285_v53 = vpop.permute.xlu2 %284 }
 0x296   :  { %v287_v54 = vmul.f32 %v285_v53, %v155_v52 }
 0x298   :  { %v294_v55 = vrot.slane %v287_v54, 4 }
 0x29a   :  { %v295_v56 = vadd.f32 %v294_v55, %v287_v54 }
 0x29c   :  { %v296_v57 = vrot.slane %v295_v56, 2 }
 0x29d   :  { %v279_v58 = vpop.permute.xlu2 %278 }
 0x29e   :  { %v297_v60 = vadd.f32 %v296_v57, %v295_v56  ;;  %v286_v61 = vmul.f32 %v279_v58, %v152_v47 }
 0x2a0   :  { %v298_v62 = vrot.slane %v297_v60, 1  ;;  %v288_v63 = vrot.slane %v286_v61, 4 }
 0x2a2   :  { %v289_v0 = vadd.f32 %v288_v63, %v286_v61  ;;  %v299_v1 = vadd.f32 %v298_v62, %v297_v60 }
 0x2a4   :  { %v290_v2 = vrot.slane %v289_v0, 2  ;;  %v306_v7 = vadd.f32 %v392_v4, %v299_v1 }
 0x2a6   :  { %v291_v5 = vadd.f32 %v290_v2, %v289_v0  ;;  %v325_v10 = vrot.slane %v306_v7, 7 }
 0x2a8   :  { %v292_v6 = vrot.slane %v291_v5, 1 }
 0x2aa   :  { %v293_v8 = vadd.f32 %v292_v6, %v291_v5 }
 0x2ac   :  { %v305_v9 = vadd.f32 %v392_v4, %v293_v8 }
 0x2ae   :  { %v327_v11 = vsel %vm326_vm12, %v325_v10, %v305_v9 }
 0x2af   :  { %345 = vmatmul.f32.vlgmr.msra.gmra.mxu3 %v327_v11 }
 0x332   :  { %v346_v49 = vpop.f32.mrf.mxu3 }
 0x333   :  { %349 = vst [vmem:[#allocation7] sm:$0x3] %v346_v49 }
 0x334   :  { %360 = dma.vmem_to_hbm [thread:$0]  %s356_s15, 32, %s358_s18, [#allocation4]  }
 0x335   :  { %515 = dma.done.wait [#allocation4], 32  }
 0x336   :  { %516 = vsyncadd [#allocation4], 4294967264 }
 0x337   :  { %517 = dma.done.wait [#allocation9], 256  }
 0x338   :  { %518 = vsyncadd [#allocation9], 4294967040 }
 0x339   :  { %382 = vsyncpa [#allocation3], 1 }
 0x33a   :  { %383 = vsyncpa [#allocation6], 1 }
 0x33b   :  { %384 = vsyncpa [#allocation4], 1 }
 0x33c   :  { %385 = vsyncpa [#allocation9], 1 }

</bundles_post_ra>
